<compile_context>
chip_gen: v6e
topology: v6e:2x2x1
jax: 0.10.0
libtpu: 0.0.40
codegen_flags: <defaults>
</compile_context>

<pallas_src>
import jax
import jax.numpy as jnp
from jax import lax
from jax.experimental import pallas as pl
from jax.experimental.pallas import tpu as pltpu


def rmsnorm_kernel(x_ref, g_ref, o_ref):
    # x_ref: (TB, C, TILE_HW)   g_ref: (C, TILE_HW), already scaled by sqrt(C).
    x = x_ref[...]
    xf = x.astype(jnp.float32)

    # Sum of squares over the channel axis, per spatial location (f32 accumulation).
    sumsq = jnp.sum(xf * xf, axis=1, keepdims=True)            # (TB, 1, TILE_HW)

    # F.normalize clamps ||x|| at 1e-12  <=>  clamp sumsq at 1e-24, then rsqrt.
    # rsqrt of the reduced vector runs on the EUP slot; the rest is plain VPU work.
    inv = lax.rsqrt(jnp.maximum(sumsq, 1e-24))                 # (TB, 1, TILE_HW)

    # Output path in the I/O dtype: for f32 inputs this is identical to full-f32
    # math; for bf16 inputs it halves the full-tile VPU op count on v6e/v7x.
    o_ref[...] = (x * inv.astype(x.dtype) * g_ref[...][None, :, :]).astype(o_ref.dtype)


def _vmem_capacity_bytes():
    try:
        return int(pltpu.get_tpu_info().vmem_capacity_bytes)
    except Exception:
        return 64 << 20  # conservative default (v7x physical VMEM)


def _pick_tiling(B, C, HW, itemsize, budget_bytes):
    """Choose (TB, TILE_HW, grid_b, grid_hw).

    Per-step VMEM accounting per (batch, lane) cell of a block:
      2x-buffered input + 2x-buffered output blocks (4 * itemsize bytes) plus
      ~2 live f32 temporaries from the in-kernel upcast/square (8 bytes).
    NOTE: for huge C (~>10K f32 channels) even a 128-lane tile would exceed the
    budget; that regime is unreachable for DDPM channel counts, so it is not
    special-cased here.
    """
    bytes_per_cell = 4 * itemsize + 8
    per_lane = C * bytes_per_cell

    if HW < 128:
        # Lane dim < 128: the only legal non-128-multiple block is the full dim.
        tile_hw = HW
    else:
        max_tile_hw = max(128, (budget_bytes // per_lane) // 128 * 128)
        tile_hw = min(max_tile_hw, (HW // 128) * 128)
    grid_hw = pl.cdiv(HW, tile_hw)

    tb = 1
    if grid_hw == 1 and B > 1:
        # Whole spatial extent fits in one tile: pack batch elements per grid step
        # so each step's DMA isn't overhead-dominated, but keep >= 2 batch steps so
        # both v7x TensorCores get work (neutral on single-TC v5e/v6e).
        max_tb = max(1, budget_bytes // (tile_hw * per_lane))
        tb = max(1, min(pl.cdiv(B, 2), max_tb))
    grid_b = pl.cdiv(B, tb)

    # Single-step grid (B == 1 and one HW tile): split the spatial axis in two when
    # legal so v7x's second TensorCore isn't idle.
    if grid_b * grid_hw == 1 and HW > 128:
        tile_hw = pl.cdiv(pl.cdiv(HW, 2), 128) * 128
        grid_hw = pl.cdiv(HW, tile_hw)

    return tb, tile_hw, grid_b, grid_hw


def rmsnorm_pallas(x, g):
    """x: (B, C, H, W) NCHW.   g: (1, C, 1, 1)."""
    B, C, H, W = x.shape
    HW = H * W
    itemsize = jnp.dtype(x.dtype).itemsize

    # Generation-aware per-step working-set budget: ~24 MiB on v5e/v6e (128 MiB
    # VMEM), ~16 MiB on v7x (64 MiB physical / 32 MiB scoped default).
    vmem_cap = _vmem_capacity_bytes()
    budget_bytes = max(8 << 20, min(24 << 20, vmem_cap // 4))

    TB, TILE_HW, grid_b, grid_hw = _pick_tiling(B, C, HW, itemsize, budget_bytes)

    x2 = x.reshape(B, C, HW)

    # Fold sqrt(C) into g and pre-broadcast to lane-dense (C, TILE_HW) in the I/O
    # dtype; constant index_map below means it is DMA'd once.
    g_col = (g.reshape(C, 1).astype(jnp.float32) * (float(C) ** 0.5)).astype(x.dtype)
    g2 = jnp.broadcast_to(g_col, (C, TILE_HW))

    # Per-step footprint estimate -> scoped-VMEM limit with headroom, capped at the
    # chip's physical VMEM.
    footprint = TB * C * TILE_HW * (4 * itemsize + 8) + 2 * C * TILE_HW * itemsize
    vmem_limit = int(min(vmem_cap, max(32 << 20, 2 * footprint)))

    cost = pl.CostEstimate(
        flops=3 * B * C * HW,
        transcendentals=B * HW,
        bytes_accessed=2 * B * C * HW * itemsize + C * TILE_HW * itemsize,
    )

    out = pl.pallas_call(
        rmsnorm_kernel,
        out_shape=jax.ShapeDtypeStruct((B, C, HW), x.dtype),
        grid_spec=pltpu.PrefetchScalarGridSpec(
            num_scalar_prefetch=0,
            grid=(grid_b, grid_hw),
            in_specs=[
                pl.BlockSpec((TB, C, TILE_HW), lambda b, t: (b, 0, t)),
                pl.BlockSpec((C, TILE_HW), lambda b, t: (0, 0)),
            ],
            out_specs=pl.BlockSpec((TB, C, TILE_HW), lambda b, t: (b, 0, t)),
        ),
        compiler_params=pltpu.CompilerParams(
            dimension_semantics=("parallel", "parallel"),
            vmem_limit_bytes=vmem_limit,
        ),
        cost_estimate=cost,
    )(x2, g2)

    return out.reshape(B, C, H, W)


def rmsnorm_ref(x, g):
    # Pure-JAX reference mirroring F.normalize(x, dim=1) * g * sqrt(C)
    C = x.shape[1]
    norm = jnp.sqrt(jnp.sum(x.astype(jnp.float32) ** 2, axis=1, keepdims=True))
    denom = jnp.maximum(norm, 1e-12)
    return ((x.astype(jnp.float32) / denom) * g * (C ** 0.5)).astype(x.dtype)


if __name__ == "__main__":
    key = jax.random.PRNGKey(0)
    B, C, H, W = 2, 4, 16, 16
    x = jax.random.normal(key, (B, C, H, W), dtype=jnp.float32)

    # Parameter from __init__: nn.Parameter(torch.ones(1, dim, 1, 1))
    g = jnp.ones((1, C, 1, 1), dtype=jnp.float32)

    y = rmsnorm_pallas(x, g)
    jax.block_until_ready(y)

    y_ref = rmsnorm_ref(x, g)
    assert jnp.allclose(y, y_ref, atol=1e-4, rtol=1e-4), "mismatch vs reference"

    print("KERNEL_OK")
</pallas_src>

<mosaic_0001>
module attributes {stable_mosaic.version = 11 : i64} {
  func.func @rmsnorm_kernel(%arg0: i32, %arg1: i32, %arg2: memref<1x4x256xf32, #tpu.memory_space<vmem>>, %arg3: memref<4x256xf32, #tpu.memory_space<vmem>>, %arg4: memref<1x4x256xf32, #tpu.memory_space<vmem>>) attributes {dimension_semantics = [#tpu.dimension_semantics<parallel>, #tpu.dimension_semantics<parallel>], iteration_bounds = array<i64: 2, 1>, scalar_prefetch = 0 : i64, scratch_operands = 0 : i64, tpu.core_type = #tpu.core_type<tc>, window_params = [{transform_indices = @transform_0, window_bounds = array<i64: 1, 4, 256>}, {pipeline_mode = #tpu.pipeline_mode<synchronous>, transform_indices = @transform_1, window_bounds = array<i64: 4, 256>}, {transform_indices = @transform_2, window_bounds = array<i64: 1, 4, 256>}]} {
    %c0 = arith.constant 0 : index
    %c0_0 = arith.constant 0 : index
    %c0_1 = arith.constant 0 : index
    %0 = vector.load %arg2[%c0, %c0_0, %c0_1] : memref<1x4x256xf32, #tpu.memory_space<vmem>>, vector<1x4x256xf32>
    %1 = arith.mulf %0, %0 : vector<1x4x256xf32>
    %cst = arith.constant dense<0.000000e+00> : vector<1x256xf32>
    %2 = vector.multi_reduction <add>, %1, %cst [1] : vector<1x4x256xf32> to vector<1x256xf32>
    %3 = vector.shape_cast %2 : vector<1x256xf32> to vector<1x1x256xf32>
    %cst_2 = arith.constant 1.000000e-24 : f32
    %4 = vector.broadcast %cst_2 : f32 to vector<1x1x256xf32>
    %5 = arith.maximumf %3, %4 : vector<1x1x256xf32>
    %6 = math.rsqrt %5 : vector<1x1x256xf32>
    %7 = vector.broadcast %6 : vector<1x1x256xf32> to vector<1x4x256xf32>
    %8 = arith.mulf %0, %7 : vector<1x4x256xf32>
    %c0_3 = arith.constant 0 : index
    %c0_4 = arith.constant 0 : index
    %9 = vector.load %arg3[%c0_3, %c0_4] : memref<4x256xf32, #tpu.memory_space<vmem>>, vector<4x256xf32>
    %10 = vector.shape_cast %9 : vector<4x256xf32> to vector<1x4x256xf32>
    %11 = arith.mulf %8, %10 : vector<1x4x256xf32>
    %c0_5 = arith.constant 0 : index
    %c0_6 = arith.constant 0 : index
    %c0_7 = arith.constant 0 : index
    %12 = vector.load %arg4[%c0_5, %c0_6, %c0_7] : memref<1x4x256xf32, #tpu.memory_space<vmem>>, vector<1x4x256xf32>
    tpu.vector_store %arg4[%c0_5, %c0_6, %c0_7], %11 {strides = array<i32>} : memref<1x4x256xf32, #tpu.memory_space<vmem>>, vector<1x4x256xf32>,
    return
  }
  func.func @transform_0(%arg0: i32, %arg1: i32) -> (i32, i32, i32) {
    %c0_i32 = arith.constant 0 : i32
    %c0_i32_0 = arith.constant 0 : i32
    return %arg0, %c0_i32, %arg1 : i32, i32, i32
  }
  func.func @transform_1(%arg0: i32, %arg1: i32) -> (i32, i32) {
    %c0_i32 = arith.constant 0 : i32
    %c0_i32_0 = arith.constant 0 : i32
    %c0_i32_1 = arith.constant 0 : i32
    return %c0_i32, %c0_i32_0 : i32, i32
  }
  func.func @transform_2(%arg0: i32, %arg1: i32) -> (i32, i32, i32) {
    %c0_i32 = arith.constant 0 : i32
    %c0_i32_0 = arith.constant 0 : i32
    return %arg0, %c0_i32, %arg1 : i32, i32, i32
  }
}

</mosaic_0001>

<bundles_post_ra>
// kernel: tpu_custom_call.1
= control target key start
LH: loop header
LB: loop body
LE: loop exit
PB: predicated region body
PF: predicated region fallthrough
CT: control target
= control target key end

     0   :  { %7 = vsyncpa [#allocation3], 0  ;;  %s755_s0 = inlined_call_operand.hbm [shape: f32[2,4,256], index: 0, kind: input, shape index: {}]   ;;  %s756_s1 = inlined_call_operand.hbm [shape: f32[4,256], index: 1, kind: input, shape index: {}]   ;;  %s757_s2 = inlined_call_operand.hbm [shape: f32[2,4,256], index: 2, kind: output, shape index: {}]  }
   0x1   :  { %9 = vsyncpa [#allocation3 + $0x1], 0 }
   0x2   :  { %10 = vsyncpa [#allocation6], 0 }
   0x3   :  { %11 = vsyncpa [#allocation4], 0 }
   0x4   :  { %13 = vsyncpa [#allocation4 + $0x1], 0  ;;  %s590_s9 = smov 0   ;;  %s592_s10 = smov 0  }
   0x5   :  { %s594_s11 = smov 0   ;;  %s596_s12 = smov 0  }
   0x6   :  { %s598_s13 = smov 0   ;;  %s600_s14 = smov 0  }
   0x7 LB: > { %s336_s15 = sadd.s32 4294967295, %s570_s14   ;;  %s337_s16 = sadd.s32 4294967294, %s570_s14   ;;  %s570_s14 = sphi %s600_s14, %s19_s14   ;;  %s566_s13 = sphi %s598_s13, %s774_s13   ;;  %s562_s12 = sphi %s596_s12, %s773_s12   ;;  %s558_s11 = sphi %s594_s11, %s772_s11   ;;  %s554_s10 = sphi %s592_s10, %s771_s10   ;;  %s550_s9 = sphi %s590_s9, %s770_s9  }
   0x8   : > { %p53_p0 = scmp.ne.s32.totalorder %s554_s10, %s550_s9  ;;  %p624_p1 = scmp.eq.s32.totalorder %s336_s15, 0 }
   0x9   : > { %p628_p2 = scmp.eq.s32.totalorder %s336_s15, 1  ;;  %p106_p3 = scmp.eq.s32.totalorder %s337_s16, 1 }
   0xa   : > { %p634_p4 = por %p624_p1, %p53_p0  ;;  %p338_p5 = scmp.ge.s32.totalorder %s570_s14, 1 }
   0xb   : > { %p639_p6 = por %p106_p3, %p53_p0  ;;  %p113_p7 = scmp.lt.s32.totalorder %s570_s14, 3 }
   0xc   : > { %s761_s19 = scalar_select %p634_p4, 1, 0 }
   0xd   : > { %s762_s20 = scalar_select %p639_p6, 1, 0 }
   0xe   : > { %p644_p8 = pnand %p338_p5, %p113_p7  ;;  %s572_s22 = smov [#allocation5]  }
   0xf   : > { %s126_s23 = sshll.u32 %s572_s22, 4  ;;  %s31_s25 = sadd.s32 1, %s566_s13  ;;  %s127_s23 = int_to_ptr.vmem [resolvable:$true] %s126_s23 }
  0x10   : > { %p363_p10 = pneg %p644_p8  ;;  %s40_s26 = sadd.s32 1, %s558_s11 }
  0x11   : > { %p33_p12 = scmp.ge.s32.totalorder %s31_s25, 2  ;;  %s443_s27 = scalar_lea.vmem %s127_s23, 128 }
  0x12   : > { %p653_p11 = pnand %p363_p10, %p624_p1  ;;  %p444_p0 = scmp.ne.s32.totalorder %s127_s23, %s443_s27 }
  0x13   : > { %p451_p7 = scmp.lt.s32.totalorder %s127_s23, %s127_s23  ;;  %p452_p6 = scmp.lt.s32.totalorder %s443_s27, %s443_s27 }
  0x14   : > { %p434_p13 = pneg %p653_p11 }
  0x15   : > { %p453_p9 = por %p452_p6, %p451_p7 }
  0x16   : > { %p446_p3 = pnand %p444_p0, %p434_p13 }
  0x18   : > { %p447_p5 = pneg %p446_p3 }
  0x1a   : > { %p454_p4 = pnand %p453_p9, %p447_p5 }
  0x1c   : > { %457 = shalt.err (!%p454_p4)
}
  0x1d   : > { %366 = dma.hbm_to_vmem [thread:$0]  (!%p653_p11), %s756_s1, 128, %s127_s23, [#allocation6]  }
  0x1e   : > { %s776_s25 = smov (%p33_p12, %s31_s25), 0  ;;  %p47_p6 = scmp.ne.s32.totalorder %s558_s11, %s554_s10 }
  0x1f   : > { %p48_p4 = scmp.eq.s32.totalorder %s570_s14, 0  ;;  %s35_s30 = ssub.s32 %s566_s13, %s776_s25 }
  0x20   : > { %p376_p9 = scmp.lt.s32.totalorder %s570_s14, 2  ;;  %p38_p10 = scmp.eq.s32.totalorder %s35_s30, 0 }
  0x21   : > { %p49_p13 = por %p48_p4, %p47_p6  ;;  %p676_p0 = por %p628_p2, %p47_p6 }
  0x22   : > { %s137_s4 = sand.u32 1, %s558_s11   ;;  %s353_s7 = sshll.u32 %s566_s13, 7 }
  0x23   : > { %s682_s5 = scalar_select %p38_p10, %s558_s11, %s40_s26  }
  0x24   : > { %s341_s6 = sshll.u32 %s137_s4, 3  ;;  %s149_s16 = scalar_lea.hbm %s755_s0, %s353_s7 }
  0x25   : > { %s141_s22 = scalar_lea.vmem [#allocation2], %s341_s6  ;;  %p688_p11 = pnand %p376_p9, %p49_p13 }
  0x26   : > { %s151_s23 = sshll.u32 %s141_s22, 4  ;;  %s138_s18 = scalar_lea.sflag [#allocation3], %s137_s4  ;;  %s152_s23 = int_to_ptr.vmem [resolvable:$true] %s151_s23 }
  0x27   : > { %p460_p2 = pneg %p688_p11  ;;  %s471_s27 = scalar_lea.vmem %s152_s23, 128 }
  0x28   : > { %p472_p12 = scmp.ne.s32.totalorder %s152_s23, %s471_s27  ;;  %s573_s26 = smov [#allocation2]  }
  0x29   : > { %s476_s28 = sshll.u32 %s573_s26, 4  ;;  %s477_s28 = int_to_ptr.vmem [resolvable:$false] %s476_s28 }
  0x2a   : > { %p474_p3 = pnand %p472_p12, %p460_p2  ;;  %s478_s29 = scalar_lea.vmem %s477_s28, 256 }
  0x2b   : > { %p479_p7 = scmp.lt.s32.totalorder %s152_s23, %s477_s28  ;;  %p480_p6 = scmp.lt.s32.totalorder %s478_s29, %s471_s27 }
  0x2c   : > { %p475_p5 = pneg %p474_p3 }
  0x2d   : > { %p481_p4 = por %p480_p6, %p479_p7 }
  0x2f   : > { %p482_p10 = pnand %p481_p4, %p475_p5 }
  0x31   : > { %485 = shalt.err (!%p482_p10)
}
  0x32   : > { %370 = dma.hbm_to_vmem [thread:$0]  (!%p688_p11), %s149_s16, 128, %s152_s23, %s138_s18  }
  0x33   : > { %160 = sbr.rel (%p644_p8) target bundleno = 112 (0x70), region = 28  ;;  %s699_s30 = sand.u32 (!%p644_p8), 1, %s554_s10  }
  0x34   : > { %s345_s4 = sshll.u32 (!%p644_p8), %s699_s30, 3  ;;  %s163_s6 = scalar_lea.sflag (!%p644_p8), [#allocation3], %s699_s30 }
  0x35   : > { %s166_s7 = scalar_lea.vmem (!%p644_p8), [#allocation2], %s345_s4  ;;  %p767_p9 = scmp.ne.s32.totalorder (!%p644_p8), %s761_s19, 0 }
  0x38   : > { %537 = dma.done.wait (%p767_p9), %s163_s6, 128  }
  0x39   : > { %539 = vsyncadd (%p767_p9), %s163_s6, 4294967168 }
  0x3a   : > { %541 = dma.done.wait (%p624_p1), [#allocation6], 128  }
  0x3b   : > { %543 = vsyncadd (%p624_p1), [#allocation6], 4294967168  ;;  %v193_v0 = vld [vmem:[%s166_s7] sm:$0xff]  ;;  %vm198_vm0 = vcmask 1043456   ;;  %v222_v22 = vld [vmem:[#allocation5] sm:$0xff]  ;;  %s190_s17 = scalar_lea.vmem [#allocation7], %s345_s4 }
  0x3c   : > { %v194_v1 = vmul.f32 %v193_v0, %v193_v0  ;;  %s242_s19 = sshll.u32 %s190_s17, 4  ;;  %s354_s21 = sshll.u32 %s562_s12, 7  ;;  %s243_s19 = int_to_ptr.vmem [resolvable:$true] %s242_s19 }
  0x3d   : > { %s240_s16 = scalar_lea.hbm %s757_s2, %s354_s21  ;;  %s226_s22 = scalar_lea.sflag [#allocation4], %s699_s30 }
  0x3e   : > { %v196_v2 = vcombine.high %v194_v1, %v194_v1  ;;  %v199_v3 = vsel %vm198_vm0, %v194_v1, 0.0  ;;  %s486_s23 = scalar_lea.vmem %s243_s19, 128  ;;  %s574_s24 = smov [#allocation7]  }
  0x3f   : > { %v200_v4 = vrot.slane %v199_v3, 4  ;;  %p487_p1 = scmp.ne.s32.totalorder %s243_s19, %s486_s23  ;;  %s490_s18 = sshll.u32 %s574_s24, 4  ;;  %s491_s18 = int_to_ptr.vmem [resolvable:$false] %s490_s18 }
  0x40   : > { %v206_v5 = vsel %vm198_vm0, %v196_v2, 0.0  ;;  %s492_s27 = scalar_lea.vmem %s491_s18, 256  ;;  %p493_p11 = scmp.lt.s32.totalorder %s243_s19, %s491_s18 }
  0x41   : > { %v201_v6 = vadd.f32 %v200_v4, %v199_v3  ;;  %v207_v7 = vrot.slane %v206_v5, 4  ;;  %p488_p8 = pnand %p487_p1, %p676_p0  ;;  %p494_p2 = scmp.lt.s32.totalorder %s492_s27, %s486_s23 }
  0x43   : > { %v202_v8 = vrot.slane %v201_v6, 2  ;;  %v208_v9 = vadd.f32 %v207_v7, %v206_v5  ;;  %p489_p13 = pneg %p488_p8  ;;  %p495_p12 = por %p494_p2, %p493_p11 }
  0x45   : > { %v203_v10 = vadd.f32 %v202_v8, %v201_v6  ;;  %v209_v11 = vrot.slane %v208_v9, 2  ;;  %p496_p3 = pnand %p495_p12, %p489_p13 }
  0x47   : > { %v204_v12 = vrot.slane %v203_v10, 1  ;;  %v210_v13 = vadd.f32 %v209_v11, %v208_v9 }
  0x49   : > { %v205_v14 = vadd.f32 %v204_v12, %v203_v10  ;;  %v211_v15 = vrot.slane %v210_v13, 1 }
  0x4b   : > { %v212_v16 = vadd.f32 %v211_v15, %v210_v13  ;;  %v213_v17 = vmax.f32 %v205_v14, 1e-24 }
  0x4d   : > { %v214_v18 = vmax.f32 %v212_v16, 1e-24  ;;  %428 = vrsqrt.f32 %v213_v17 }
  0x4f   : > { %430 = vrsqrt.f32 %v214_v18 }
  0x5a   : > { %v429_v19 = vpop.eup %428 }
  0x5c   : > { %v431_v20 = vpop.eup %430 }
  0x5d   : > { %v219_v21 = vcombine.low %v429_v19, %v431_v20 }
  0x5f   : > { %v221_v23 = vmul.f32 %v219_v21, %v193_v0 }
  0x61   : > { %v223_v24 = vmul.f32 %v222_v22, %v221_v23 }
  0x63   : > { %224 = vst [vmem:[%s190_s17] sm:$0xff] %v223_v24 }
  0x64   : > { %499 = shalt.err (!%p496_p3)
}
  0x65   : > { %s500_s12 = scalar_lea.hbm %s240_s16, 128  ;;  %s504_s29 = scalar_lea.hbm %s757_s2, 256 }
  0x66   : > { %p501_p5 = scmp.ne.s32.totalorder %s240_s16, %s500_s12  ;;  %p505_p4 = scmp.lt.s32.totalorder %s240_s16, %s757_s2 }
  0x67   : > { %p506_p10 = scmp.lt.s32.totalorder %s504_s29, %s500_s12 }
  0x68   : > { %p502_p7 = pnand %p501_p5, %p676_p0 }
  0x69   : > { %p507_p9 = por %p506_p10, %p505_p4 }
  0x6a   : > { %p503_p6 = pneg %p502_p7 }
  0x6c   : > { %p508_p1 = pnand %p507_p9, %p503_p6 }
  0x6e   : > { %511 = shalt.err (!%p508_p1)
}
  0x6f   : > { %361 = dma.vmem_to_hbm [thread:$0]  (%p676_p0), %s243_s19, 128, %s240_s16, %s226_s22  }
  0x70 PF: > { %s254_s6 = sand.u32 1, %s550_s9   ;;  %p768_p8 = scmp.ne.s32.totalorder %s762_s20, 0 }
  0x71   : > { %p769_p13 = scmp.ge.s32.totalorder %s570_s14, 2  ;;  %s255_s7 = scalar_lea.sflag [#allocation4], %s254_s6 }
  0x73   : > { %p372_p11 = pnand %p769_p13, %p768_p8 }
  0x75   : > { %p373_p2 = pneg %p372_p11 }
  0x77   : > { %545 = dma.done.wait (%p373_p2), %s255_s7, 128  }
  0x78   : > { %547 = vsyncadd (%p373_p2), %s255_s7, 4294967168  ;;  %s19_s14 = sadd.s32 1, %s570_s14   ;;  %s770_s9 = smov %s554_s10 }
  0x79   : > { %p16_p12 = scmp.ge.s32.totalorder %s19_s14, 4   ;;  %s771_s10 = smov %s558_s11 }
  0x7a   : > { %s772_s11 = smov %s682_s5  ;;  %s773_s12 = smov %s566_s13 }
  0x7b   : > { %s774_s13 = smov %s776_s25  ;;  %18 = sbr.rel (!%p16_p12) target bundleno = 7 (0x7), region = 77 }
  0x80   :  { %260 = vsyncpa [#allocation3], 1 }
  0x81   :  { %262 = vsyncpa [#allocation3 + $0x1], 1 }
  0x82   :  { %263 = vsyncpa [#allocation6], 1 }
  0x83   :  { %264 = vsyncpa [#allocation4], 1 }
  0x84   :  { %266 = vsyncpa [#allocation4 + $0x1], 1 }

</bundles_post_ra>
